<compile_context>
chip_gen: v5e
topology: v5e:2x2
jax: 0.10.0
libtpu: 0.0.40
codegen_flags: <defaults>
</compile_context>

<pallas_src>
import functools

import jax
import jax.numpy as jnp
from jax.experimental import pallas as pl
from jax.experimental.pallas import tpu as pltpu


def _pick_tile(dim, target, bases=(128, 8)):
    """Largest tile <= target that is a multiple of one of `bases` (tried in
    order) and divides `dim`; falls back to the full extent (always legal)."""
    if dim <= target:
        return dim
    for base in bases:
        t = (target // base) * base
        while t >= base:
            if dim % t == 0:
                return t
            t -= base
    return dim


# ----------------------------------------------------------------------------
# Kernel 1: QKV projection.  One pass over x, three outputs (q, k, v) in bf16.
# Avoids producing the packed (B*N, 3*inner) tensor + the HBM transpose that the
# attention kernel would otherwise require.
# ----------------------------------------------------------------------------
def _qkv_proj_kernel(x_ref, wq_ref, wk_ref, wv_ref, q_ref, k_ref, v_ref,
                     acc_q, acc_k, acc_v):
    @pl.when(pl.program_id(2) == 0)
    def _():
        acc_q[...] = jnp.zeros_like(acc_q)
        acc_k[...] = jnp.zeros_like(acc_k)
        acc_v[...] = jnp.zeros_like(acc_v)

    x = x_ref[...].astype(jnp.bfloat16)      # bf16 MXU operands, f32 accumulate
    acc_q[...] += jnp.dot(x, wq_ref[...], preferred_element_type=jnp.float32)
    acc_k[...] += jnp.dot(x, wk_ref[...], preferred_element_type=jnp.float32)
    acc_v[...] += jnp.dot(x, wv_ref[...], preferred_element_type=jnp.float32)

    @pl.when(pl.program_id(2) == pl.num_programs(2) - 1)
    def _():
        q_ref[...] = acc_q[...].astype(q_ref.dtype)
        k_ref[...] = acc_k[...].astype(k_ref.dtype)
        v_ref[...] = acc_v[...].astype(v_ref.dtype)


def qkv_projection(x2d, w_q, w_k, w_v, *, tm=256, tn=512, tk=512):
    M, K = x2d.shape
    Kw, Nout = w_q.shape
    assert K == Kw and w_k.shape == w_q.shape and w_v.shape == w_q.shape
    bm = _pick_tile(M, tm, (128, 8))     # prefer 128-multiples for MXU rows
    bn = _pick_tile(Nout, tn, (128,))
    bk = _pick_tile(K, tk, (128, 8))
    grid = (M // bm, Nout // bn, K // bk)

    out_sds = jax.ShapeDtypeStruct((M, Nout), jnp.bfloat16)
    w_spec = pl.BlockSpec((bk, bn), lambda i, j, k: (k, j))
    o_spec = pl.BlockSpec((bm, bn), lambda i, j, k: (i, j))
    return pl.pallas_call(
        _qkv_proj_kernel,
        out_shape=(out_sds, out_sds, out_sds),
        grid_spec=pltpu.PrefetchScalarGridSpec(
            num_scalar_prefetch=0,
            grid=grid,
            in_specs=[
                pl.BlockSpec((bm, bk), lambda i, j, k: (i, k)),
                w_spec, w_spec, w_spec,
            ],
            out_specs=[o_spec, o_spec, o_spec],
            scratch_shapes=[pltpu.VMEM((bm, bn), jnp.float32)] * 3,
        ),
        compiler_params=pltpu.CompilerParams(
            dimension_semantics=("parallel", "parallel", "arbitrary")),
    )(x2d, w_q, w_k, w_v)


# ----------------------------------------------------------------------------
# Kernel 2: flash-style attention over (B, N, heads*dim_head) q/k/v, fused
# head-merge + output projection in the epilogue.
# ----------------------------------------------------------------------------
def _flash_attn_proj_kernel(q_ref, k_ref, v_ref, wo_ref, bo_ref, o_ref,
                            m_sc, l_sc, acc_sc, *, heads, dim_head):
    kv = pl.program_id(2)

    @pl.when(kv == 0)
    def _():
        m_sc[...] = jnp.full_like(m_sc, -jnp.inf)
        l_sc[...] = jnp.zeros_like(l_sc)
        acc_sc[...] = jnp.zeros_like(acc_sc)

    d = dim_head
    # Heads live in the lane dimension of q/k/v; slice them out with static lane
    # slices (no in-kernel (bq,H,d)<->(H,bq,d) transpose needed).  `heads` is
    # small so a static Python loop is fine.
    for h in range(heads):
        q_h = q_ref[0, :, h * d:(h + 1) * d]          # (bq, d)  bf16; scale in W_q
        k_h = k_ref[0, :, h * d:(h + 1) * d]          # (bk, d)  bf16
        v_h = v_ref[0, :, h * d:(h + 1) * d]          # (bk, d)  bf16

        # scores: contract over d, bf16 operands, f32 accumulation.
        s = jnp.einsum("qd,kd->qk", q_h, k_h,
                       preferred_element_type=jnp.float32)     # (bq, bk)

        m_prev = m_sc[h]                                        # (bq, 1)
        m_new = jnp.maximum(m_prev, jnp.max(s, axis=-1, keepdims=True))
        alpha = jnp.exp(m_prev - m_new)
        p = jnp.exp(s - m_new)                                  # f32 (EUP)
        l_sc[h] = alpha * l_sc[h] + jnp.sum(p, axis=-1, keepdims=True)
        acc_sc[h] = alpha * acc_sc[h] + jnp.dot(
            p.astype(jnp.bfloat16), v_h, preferred_element_type=jnp.float32)
        m_sc[h] = m_new

    @pl.when(kv == pl.num_programs(2) - 1)
    def _():
        # Normalize each head (EUP approx reciprocal), merge heads along lanes,
        # then ONE deep output-projection matmul: (bq, heads*d) @ (heads*d, dim).
        parts = []
        for h in range(heads):
            inv_l = pl.reciprocal(l_sc[h], approx=True)
            parts.append((acc_sc[h] * inv_l).astype(jnp.bfloat16))
        merged = jnp.concatenate(parts, axis=-1)                # (bq, heads*d)
        out = jnp.dot(merged, wo_ref[...], preferred_element_type=jnp.float32)
        out = out + bo_ref[...]                                 # (1, dim) broadcast
        o_ref[0] = out.astype(o_ref.dtype)                      # lane-dense store


def flash_attention_proj(q, k, v, w_out, b_out, *, heads, dim_head, out_dtype,
                         tq=256, tk=512):
    B, N, inner = q.shape
    dim_out = w_out.shape[-1]
    bq = _pick_tile(N, tq, (128, 8))
    bk = _pick_tile(N, tk, (128, 8))
    bo = b_out.reshape(1, dim_out)
    kern = functools.partial(_flash_attn_proj_kernel, heads=heads, dim_head=dim_head)
    q_spec = pl.BlockSpec((1, bq, inner), lambda b, qi, ki: (b, qi, 0))
    kv_spec = pl.BlockSpec((1, bk, inner), lambda b, qi, ki: (b, ki, 0))
    return pl.pallas_call(
        kern,
        out_shape=jax.ShapeDtypeStruct((B, N, dim_out), out_dtype),
        grid_spec=pltpu.PrefetchScalarGridSpec(
            num_scalar_prefetch=0,
            grid=(B, N // bq, N // bk),
            in_specs=[
                q_spec,
                kv_spec,
                kv_spec,
                pl.BlockSpec((inner, dim_out), lambda b, qi, ki: (0, 0)),
                pl.BlockSpec((1, dim_out), lambda b, qi, ki: (0, 0)),
            ],
            out_specs=pl.BlockSpec((1, bq, dim_out), lambda b, qi, ki: (b, qi, 0)),
            scratch_shapes=[
                pltpu.VMEM((heads, bq, 1), jnp.float32),         # running max m
                pltpu.VMEM((heads, bq, 1), jnp.float32),         # running sum l
                pltpu.VMEM((heads, bq, dim_head), jnp.float32),  # unnormalized out
            ],
        ),
        compiler_params=pltpu.CompilerParams(
            dimension_semantics=("parallel", "parallel", "arbitrary")),
    )(q, k, v, w_out, bo)


def _flash_attn_kernel(q_ref, k_ref, v_ref, o_ref, m_sc, l_sc, acc_sc):
    # project_out=False path (heads == 1 and dim_head == dim).
    kv = pl.program_id(2)

    @pl.when(kv == 0)
    def _():
        m_sc[...] = jnp.full_like(m_sc, -jnp.inf)
        l_sc[...] = jnp.zeros_like(l_sc)
        acc_sc[...] = jnp.zeros_like(acc_sc)

    q = q_ref[0]                                                # (bq, d) bf16
    k = k_ref[0]
    v = v_ref[0]
    s = jnp.einsum("qd,kd->qk", q, k, preferred_element_type=jnp.float32)
    m_prev = m_sc[0]
    m_new = jnp.maximum(m_prev, jnp.max(s, axis=-1, keepdims=True))
    alpha = jnp.exp(m_prev - m_new)
    p = jnp.exp(s - m_new)
    l_sc[0] = alpha * l_sc[0] + jnp.sum(p, axis=-1, keepdims=True)
    acc_sc[0] = alpha * acc_sc[0] + jnp.dot(
        p.astype(jnp.bfloat16), v, preferred_element_type=jnp.float32)
    m_sc[0] = m_new

    @pl.when(kv == pl.num_programs(2) - 1)
    def _():
        inv_l = pl.reciprocal(l_sc[0], approx=True)
        o_ref[0] = (acc_sc[0] * inv_l).astype(o_ref.dtype)


def flash_attention(q, k, v, *, out_dtype, tq=256, tk=512):
    B, N, d = q.shape
    bq = _pick_tile(N, tq, (128, 8))
    bk = _pick_tile(N, tk, (128, 8))
    return pl.pallas_call(
        _flash_attn_kernel,
        out_shape=jax.ShapeDtypeStruct((B, N, d), out_dtype),
        grid_spec=pltpu.PrefetchScalarGridSpec(
            num_scalar_prefetch=0,
            grid=(B, N // bq, N // bk),
            in_specs=[
                pl.BlockSpec((1, bq, d), lambda b, qi, ki: (b, qi, 0)),
                pl.BlockSpec((1, bk, d), lambda b, qi, ki: (b, ki, 0)),
                pl.BlockSpec((1, bk, d), lambda b, qi, ki: (b, ki, 0)),
            ],
            out_specs=pl.BlockSpec((1, bq, d), lambda b, qi, ki: (b, qi, 0)),
            scratch_shapes=[
                pltpu.VMEM((1, bq, 1), jnp.float32),
                pltpu.VMEM((1, bq, 1), jnp.float32),
                pltpu.VMEM((1, bq, d), jnp.float32),
            ],
        ),
        compiler_params=pltpu.CompilerParams(
            dimension_semantics=("parallel", "parallel", "arbitrary")),
    )(q, k, v)


# ----------------------------------------------------------------------------
# Parameters + forward pass (matches the PyTorch module semantics)
# ----------------------------------------------------------------------------
class AttentionParams:
    """Deterministically initialized parameters matching the PyTorch module."""

    def __init__(self, key, dim, heads=8, dim_head=64, dtype=jnp.float32):
        inner_dim = dim_head * heads
        self.dim = dim
        self.heads = heads
        self.dim_head = dim_head
        self.inner_dim = inner_dim
        self.scale = dim_head ** (-0.5)
        self.project_out = not (heads == 1 and dim_head == dim)

        k1, k2, k3 = jax.random.split(key, 3)
        # Stored as (in, out) so the forward pass is x @ W (== torch's x @ W^T).
        self.w_qkv = jax.random.normal(k1, (dim, inner_dim * 3), dtype) * 0.02

        # Kernel-side copies: pre-split, softmax scale folded into W_q (one-time,
        # free), bf16 operands for the MXU (f32 accumulation happens in-kernel).
        w_q, w_k, w_v = jnp.split(self.w_qkv, 3, axis=-1)
        self.w_q_kernel = (w_q * self.scale).astype(jnp.bfloat16)
        self.w_k_kernel = w_k.astype(jnp.bfloat16)
        self.w_v_kernel = w_v.astype(jnp.bfloat16)

        if self.project_out:
            self.w_out = jax.random.normal(k2, (inner_dim, dim), dtype) * 0.02
            self.b_out = jax.random.normal(k3, (dim,), dtype) * 0.02
            self.w_out_kernel = self.w_out.astype(jnp.bfloat16)
        else:
            self.w_out = None
            self.b_out = None
            self.w_out_kernel = None


def attention_forward(params: AttentionParams, x, *,
                      attn_block_q=256, attn_block_kv=512):
    # x: (B, N, dim)
    B, N, dim = x.shape
    inner = params.inner_dim

    # ---- to_qkv: one tiled/pipelined pass, three bf16 outputs (no packed qkv
    #      tensor, no HBM transpose between the two pallas_calls) ----
    x2d = x.reshape(B * N, dim)
    q2d, k2d, v2d = qkv_projection(x2d, params.w_q_kernel, params.w_k_kernel,
                                   params.w_v_kernel)
    q = q2d.reshape(B, N, inner)
    k = k2d.reshape(B, N, inner)
    v = v2d.reshape(B, N, inner)

    if params.project_out:
        # Flash attention with head-merge + output projection fused into the
        # epilogue; writes (B, N, dim) directly.
        out = flash_attention_proj(
            q, k, v, params.w_out_kernel, params.b_out,
            heads=params.heads, dim_head=params.dim_head, out_dtype=x.dtype,
            tq=attn_block_q, tk=attn_block_kv)
    else:
        out = flash_attention(q, k, v, out_dtype=x.dtype,
                              tq=attn_block_q, tk=attn_block_kv)
    # Dropout(p=0.0) is the identity.
    return out


# ----------------------------------------------------------------------------
# Reference (plain JAX, f32) for sanity checks
# ----------------------------------------------------------------------------
def attention_reference(params: AttentionParams, x):
    B, N, dim = x.shape
    H, d = params.heads, params.dim_head
    inner = params.inner_dim
    qkv = x @ params.w_qkv
    q, k, v = jnp.split(qkv, 3, axis=-1)

    def to_heads(t):
        return t.reshape(B, N, H, d).transpose(0, 2, 1, 3)

    q, k, v = map(to_heads, (q, k, v))
    dots = jnp.einsum("bhnd,bhmd->bhnm", q, k) * params.scale
    attn = jax.nn.softmax(dots, axis=-1)
    out = jnp.einsum("bhnm,bhmd->bhnd", attn, v)
    out = out.transpose(0, 2, 1, 3).reshape(B, N, inner)
    if params.project_out:
        out = out @ params.w_out + params.b_out
    return out


if __name__ == "__main__":
    key = jax.random.PRNGKey(0)

    # Tolerances account for bf16 MXU operands (f32 accumulation) and the EUP
    # approximate reciprocal used for softmax normalization.
    ATOL = RTOL = 2e-2

    # --- Test 1: small shapes, full-extent blocks (grid == 1 everywhere) -----
    k1, k2 = jax.random.split(key)
    B, N, dim = 2, 8, 32
    params = AttentionParams(k2, dim, heads=4, dim_head=16)
    x = jax.random.normal(k1, (B, N, dim), jnp.float32)
    out = jax.block_until_ready(attention_forward(params, x))
    ref = attention_reference(params, x)
    assert out.shape == (B, N, dim), out.shape
    err = float(jnp.max(jnp.abs(out - ref)))
    assert jnp.allclose(out, ref, atol=ATOL, rtol=RTOL), f"test1 max err {err}"

    # --- Test 2: tiled path (grid > 1 on q and kv axes, online-softmax
    #             accumulation across kv steps actually exercised) ------------
    k3, k4 = jax.random.split(k1)
    B2, N2, dim2 = 2, 256, 64
    params2 = AttentionParams(k4, dim2, heads=4, dim_head=32)
    x2 = jax.random.normal(k3, (B2, N2, dim2), jnp.float32)
    out2 = jax.block_until_ready(
        attention_forward(params2, x2, attn_block_q=128, attn_block_kv=128))
    ref2 = attention_reference(params2, x2)
    err2 = float(jnp.max(jnp.abs(out2 - ref2)))
    assert jnp.allclose(out2, ref2, atol=ATOL, rtol=RTOL), f"test2 max err {err2}"

    # --- Test 3: project_out=False branch (heads == 1, dim_head == dim) ------
    k5, k6 = jax.random.split(k3)
    B3, N3, dim3 = 2, 64, 64
    params3 = AttentionParams(k6, dim3, heads=1, dim_head=64)
    x3 = jax.random.normal(k5, (B3, N3, dim3), jnp.float32)
    out3 = jax.block_until_ready(attention_forward(params3, x3))
    ref3 = attention_reference(params3, x3)
    err3 = float(jnp.max(jnp.abs(out3 - ref3)))
    assert jnp.allclose(out3, ref3, atol=ATOL, rtol=RTOL), f"test3 max err {err3}"

    print("KERNEL_OK")
</pallas_src>

<mosaic_0001>
module attributes {stable_mosaic.version = 11 : i64} {
  func.func @_qkv_proj_kernel(%arg0: i32, %arg1: i32, %arg2: i32, %arg3: memref<16x32xf32, #tpu.memory_space<vmem>>, %arg4: memref<32x64xbf16, #tpu.memory_space<vmem>>, %arg5: memref<32x64xbf16, #tpu.memory_space<vmem>>, %arg6: memref<32x64xbf16, #tpu.memory_space<vmem>>, %arg7: memref<16x64xbf16, #tpu.memory_space<vmem>>, %arg8: memref<16x64xbf16, #tpu.memory_space<vmem>>, %arg9: memref<16x64xbf16, #tpu.memory_space<vmem>>, %arg10: memref<16x64xf32, #tpu.memory_space<vmem>>, %arg11: memref<16x64xf32, #tpu.memory_space<vmem>>, %arg12: memref<16x64xf32, #tpu.memory_space<vmem>>) attributes {dimension_semantics = [#tpu.dimension_semantics<parallel>, #tpu.dimension_semantics<parallel>, #tpu.dimension_semantics<arbitrary>], iteration_bounds = array<i64: 1, 1, 1>, scalar_prefetch = 0 : i64, scratch_operands = 3 : i64, tpu.core_type = #tpu.core_type<tc>, window_params = [{transform_indices = @transform_0, window_bounds = array<i64: 16, 32>}, {transform_indices = @transform_1, window_bounds = array<i64: 32, 64>}, {transform_indices = @transform_2, window_bounds = array<i64: 32, 64>}, {transform_indices = @transform_3, window_bounds = array<i64: 32, 64>}, {transform_indices = @transform_4, window_bounds = array<i64: 16, 64>}, {transform_indices = @transform_5, window_bounds = array<i64: 16, 64>}, {transform_indices = @transform_6, window_bounds = array<i64: 16, 64>}]} {
    %c0_i32 = arith.constant 0 : i32
    %0 = arith.cmpi eq, %arg2, %c0_i32 : i32
    %1 = arith.extui %0 : i1 to i32
    %c0_i32_0 = arith.constant 0 : i32
    %2 = arith.cmpi ne, %1, %c0_i32_0 : i32
    scf.if %2 {
      %cst_24 = arith.constant 0.000000e+00 : f32
      %23 = vector.broadcast %cst_24 : f32 to vector<16x64xf32>
      %c0_25 = arith.constant 0 : index
      %c0_26 = arith.constant 0 : index
      %24 = vector.load %arg10[%c0_25, %c0_26] : memref<16x64xf32, #tpu.memory_space<vmem>>, vector<16x64xf32>
      tpu.vector_store %arg10[%c0_25, %c0_26], %23 {strides = array<i32>} : memref<16x64xf32, #tpu.memory_space<vmem>>, vector<16x64xf32>,
      %cst_27 = arith.constant 0.000000e+00 : f32
      %25 = vector.broadcast %cst_27 : f32 to vector<16x64xf32>
      %c0_28 = arith.constant 0 : index
      %c0_29 = arith.constant 0 : index
      %26 = vector.load %arg11[%c0_28, %c0_29] : memref<16x64xf32, #tpu.memory_space<vmem>>, vector<16x64xf32>
      tpu.vector_store %arg11[%c0_28, %c0_29], %25 {strides = array<i32>} : memref<16x64xf32, #tpu.memory_space<vmem>>, vector<16x64xf32>,
      %cst_30 = arith.constant 0.000000e+00 : f32
      %27 = vector.broadcast %cst_30 : f32 to vector<16x64xf32>
      %c0_31 = arith.constant 0 : index
      %c0_32 = arith.constant 0 : index
      %28 = vector.load %arg12[%c0_31, %c0_32] : memref<16x64xf32, #tpu.memory_space<vmem>>, vector<16x64xf32>
      tpu.vector_store %arg12[%c0_31, %c0_32], %27 {strides = array<i32>} : memref<16x64xf32, #tpu.memory_space<vmem>>, vector<16x64xf32>,
    } else {
    }
    %c0 = arith.constant 0 : index
    %c0_1 = arith.constant 0 : index
    %3 = vector.load %arg3[%c0, %c0_1] : memref<16x32xf32, #tpu.memory_space<vmem>>, vector<16x32xf32>
    %4 = arith.truncf %3 : vector<16x32xf32> to vector<16x32xbf16>
    %c0_2 = arith.constant 0 : index
    %c0_3 = arith.constant 0 : index
    %5 = vector.load %arg10[%c0_2, %c0_3] : memref<16x64xf32, #tpu.memory_space<vmem>>, vector<16x64xf32>
    %c0_4 = arith.constant 0 : index
    %c0_5 = arith.constant 0 : index
    %6 = vector.load %arg4[%c0_4, %c0_5] : memref<32x64xbf16, #tpu.memory_space<vmem>>, vector<32x64xbf16>
    %cst = arith.constant dense<0.000000e+00> : vector<16x64xf32>
    %7 = tpu.matmul %4, %6, %cst {dimension_numbers = #tpu.dot_dimension_numbers<[1], [0], [0], [1], [0, 0, 1, 1], [], []>} : vector<16x32xbf16>, vector<32x64xbf16>, vector<16x64xf32> -> vector<16x64xf32>
    %8 = arith.addf %5, %7 : vector<16x64xf32>
    %c0_6 = arith.constant 0 : index
    %c0_7 = arith.constant 0 : index
    %9 = vector.load %arg10[%c0_6, %c0_7] : memref<16x64xf32, #tpu.memory_space<vmem>>, vector<16x64xf32>
    tpu.vector_store %arg10[%c0_6, %c0_7], %8 {strides = array<i32>} : memref<16x64xf32, #tpu.memory_space<vmem>>, vector<16x64xf32>,
    %c0_8 = arith.constant 0 : index
    %c0_9 = arith.constant 0 : index
    %10 = vector.load %arg11[%c0_8, %c0_9] : memref<16x64xf32, #tpu.memory_space<vmem>>, vector<16x64xf32>
    %c0_10 = arith.constant 0 : index
    %c0_11 = arith.constant 0 : index
    %11 = vector.load %arg5[%c0_10, %c0_11] : memref<32x64xbf16, #tpu.memory_space<vmem>>, vector<32x64xbf16>
    %cst_12 = arith.constant dense<0.000000e+00> : vector<16x64xf32>
    %12 = tpu.matmul %4, %11, %cst_12 {dimension_numbers = #tpu.dot_dimension_numbers<[1], [0], [0], [1], [0, 0, 1, 1], [], []>} : vector<16x32xbf16>, vector<32x64xbf16>, vector<16x64xf32> -> vector<16x64xf32>
    %13 = arith.addf %10, %12 : vector<16x64xf32>
    %c0_13 = arith.constant 0 : index
    %c0_14 = arith.constant 0 : index
    %14 = vector.load %arg11[%c0_13, %c0_14] : memref<16x64xf32, #tpu.memory_space<vmem>>, vector<16x64xf32>
    tpu.vector_store %arg11[%c0_13, %c0_14], %13 {strides = array<i32>} : memref<16x64xf32, #tpu.memory_space<vmem>>, vector<16x64xf32>,
    %c0_15 = arith.constant 0 : index
    %c0_16 = arith.constant 0 : index
    %15 = vector.load %arg12[%c0_15, %c0_16] : memref<16x64xf32, #tpu.memory_space<vmem>>, vector<16x64xf32>
    %c0_17 = arith.constant 0 : index
    %c0_18 = arith.constant 0 : index
    %16 = vector.load %arg6[%c0_17, %c0_18] : memref<32x64xbf16, #tpu.memory_space<vmem>>, vector<32x64xbf16>
    %cst_19 = arith.constant dense<0.000000e+00> : vector<16x64xf32>
    %17 = tpu.matmul %4, %16, %cst_19 {dimension_numbers = #tpu.dot_dimension_numbers<[1], [0], [0], [1], [0, 0, 1, 1], [], []>} : vector<16x32xbf16>, vector<32x64xbf16>, vector<16x64xf32> -> vector<16x64xf32>
    %18 = arith.addf %15, %17 : vector<16x64xf32>
    %c0_20 = arith.constant 0 : index
    %c0_21 = arith.constant 0 : index
    %19 = vector.load %arg12[%c0_20, %c0_21] : memref<16x64xf32, #tpu.memory_space<vmem>>, vector<16x64xf32>
    tpu.vector_store %arg12[%c0_20, %c0_21], %18 {strides = array<i32>} : memref<16x64xf32, #tpu.memory_space<vmem>>, vector<16x64xf32>,
    %c0_i32_22 = arith.constant 0 : i32
    %20 = arith.cmpi eq, %arg2, %c0_i32_22 : i32
    %21 = arith.extui %20 : i1 to i32
    %c0_i32_23 = arith.constant 0 : i32
    %22 = arith.cmpi ne, %21, %c0_i32_23 : i32
    scf.if %22 {
      %c0_24 = arith.constant 0 : index
      %c0_25 = arith.constant 0 : index
      %23 = vector.load %arg10[%c0_24, %c0_25] : memref<16x64xf32, #tpu.memory_space<vmem>>, vector<16x64xf32>
      %24 = arith.truncf %23 : vector<16x64xf32> to vector<16x64xbf16>
      %c0_26 = arith.constant 0 : index
      %c0_27 = arith.constant 0 : index
      %25 = vector.load %arg7[%c0_26, %c0_27] : memref<16x64xbf16, #tpu.memory_space<vmem>>, vector<16x64xbf16>
      tpu.vector_store %arg7[%c0_26, %c0_27], %24 {strides = array<i32>} : memref<16x64xbf16, #tpu.memory_space<vmem>>, vector<16x64xbf16>,
      %c0_28 = arith.constant 0 : index
      %c0_29 = arith.constant 0 : index
      %26 = vector.load %arg11[%c0_28, %c0_29] : memref<16x64xf32, #tpu.memory_space<vmem>>, vector<16x64xf32>
      %27 = arith.truncf %26 : vector<16x64xf32> to vector<16x64xbf16>
      %c0_30 = arith.constant 0 : index
      %c0_31 = arith.constant 0 : index
      %28 = vector.load %arg8[%c0_30, %c0_31] : memref<16x64xbf16, #tpu.memory_space<vmem>>, vector<16x64xbf16>
      tpu.vector_store %arg8[%c0_30, %c0_31], %27 {strides = array<i32>} : memref<16x64xbf16, #tpu.memory_space<vmem>>, vector<16x64xbf16>,
      %c0_32 = arith.constant 0 : index
      %c0_33 = arith.constant 0 : index
      %29 = vector.load %arg12[%c0_32, %c0_33] : memref<16x64xf32, #tpu.memory_space<vmem>>, vector<16x64xf32>
      %30 = arith.truncf %29 : vector<16x64xf32> to vector<16x64xbf16>
      %c0_34 = arith.constant 0 : index
      %c0_35 = arith.constant 0 : index
      %31 = vector.load %arg9[%c0_34, %c0_35] : memref<16x64xbf16, #tpu.memory_space<vmem>>, vector<16x64xbf16>
      tpu.vector_store %arg9[%c0_34, %c0_35], %30 {strides = array<i32>} : memref<16x64xbf16, #tpu.memory_space<vmem>>, vector<16x64xbf16>,
    } else {
    }
    return
  }
  func.func @transform_0(%arg0: i32, %arg1: i32, %arg2: i32) -> (i32, i32) {
    %c0_i32 = arith.constant 0 : i32
    return %arg0, %arg2 : i32, i32
  }
  func.func @transform_1(%arg0: i32, %arg1: i32, %arg2: i32) -> (i32, i32) {
    %c0_i32 = arith.constant 0 : i32
    return %arg2, %arg1 : i32, i32
  }
  func.func @transform_2(%arg0: i32, %arg1: i32, %arg2: i32) -> (i32, i32) {
    %c0_i32 = arith.constant 0 : i32
    return %arg2, %arg1 : i32, i32
  }
  func.func @transform_3(%arg0: i32, %arg1: i32, %arg2: i32) -> (i32, i32) {
    %c0_i32 = arith.constant 0 : i32
    return %arg2, %arg1 : i32, i32
  }
  func.func @transform_4(%arg0: i32, %arg1: i32, %arg2: i32) -> (i32, i32) {
    %c0_i32 = arith.constant 0 : i32
    return %arg0, %arg1 : i32, i32
  }
  func.func @transform_5(%arg0: i32, %arg1: i32, %arg2: i32) -> (i32, i32) {
    %c0_i32 = arith.constant 0 : i32
    return %arg0, %arg1 : i32, i32
  }
  func.func @transform_6(%arg0: i32, %arg1: i32, %arg2: i32) -> (i32, i32) {
    %c0_i32 = arith.constant 0 : i32
    return %arg0, %arg1 : i32, i32
  }
}

</mosaic_0001>

<bundles_post_ra>
// kernel: tpu_custom_call.1
= control target key start
LH: loop header
LB: loop body
LE: loop exit
PB: predicated region body
PF: predicated region fallthrough
CT: control target
= control target key end

     0   :  { %12 = vsyncpa [#allocation6], 0  ;;  %s618_s0 = inlined_call_operand.hbm [shape: f32[16,32], index: 0, kind: input, shape index: {}]   ;;  %s619_s1 = inlined_call_operand.hbm [shape: bf16[32,64], index: 1, kind: input, shape index: {}]   ;;  %s620_s2 = inlined_call_operand.hbm [shape: bf16[32,64], index: 2, kind: input, shape index: {}]   ;;  %s621_s3 = inlined_call_operand.hbm [shape: bf16[32,64], index: 3, kind: input, shape index: {}]   ;;  %s622_s4 = inlined_call_operand.hbm [shape: bf16[16,64], index: 4, kind: output, shape index: {0}]   ;;  %s623_s5 = inlined_call_operand.hbm [shape: bf16[16,64], index: 5, kind: output, shape index: {1}]   ;;  %s624_s6 = inlined_call_operand.hbm [shape: bf16[16,64], index: 6, kind: output, shape index: {2}]  }
   0x1   :  { %13 = vsyncpa [#allocation9], 0 }
   0x2   :  { %14 = vsyncpa [#allocation12], 0 }
   0x3   :  { %15 = vsyncpa [#allocation7], 0  ;;  %s34_s23 = sshll.u32 %s619_s1, 4  ;;  %s35_s23 = int_to_ptr.hbm [resolvable:$true] %s34_s23 }
   0x4   :  { %16 = vsyncpa [#allocation15], 0  ;;  %s514_s24 = smov [#allocation8]   ;;  %s21_s28 = sshll.u32 %s618_s0, 4  ;;  %s22_s28 = int_to_ptr.hbm [resolvable:$true] %s21_s28 }
   0x5   :  { %s36_s25 = sshll.u32 %s514_s24, 4  ;;  %s515_s29 = smov 64   ;;  %s37_s25 = int_to_ptr.vmem [resolvable:$true] %s36_s25 }
   0x6   :  { %s516_s30 = smov 4   ;;  %s517_s7 = smov [#allocation5]  }
   0x7   :  { %42 = dma.hbm_to_vmem [thread:$0]  %s35_s23, 256, %s37_s25, [#allocation9], %s515_s29, %s515_s29, %s516_s30  }
   0x8   :  { %s23_s8 = sshll.u32 %s517_s7, 4  ;;  %s518_s1 = smov 128   ;;  %s24_s8 = int_to_ptr.vmem [resolvable:$true] %s23_s8 }
   0x9   :  { %s519_s9 = smov 8   ;;  %s47_s12 = sshll.u32 %s620_s2, 4  ;;  %s48_s12 = int_to_ptr.hbm [resolvable:$true] %s47_s12 }
   0xa   :  { %29 = dma.hbm_to_vmem [thread:$0]  %s22_s28, 256, %s24_s8, [#allocation6], %s518_s1, %s518_s1, %s519_s9  }
   0xb   :  { %s520_s13 = smov [#allocation10]   ;;  %s60_s16 = sshll.u32 %s621_s3, 4  ;;  %s61_s16 = int_to_ptr.hbm [resolvable:$true] %s60_s16 }
   0xc   :  { %s49_s0 = sshll.u32 %s520_s13, 4  ;;  %s521_s17 = smov [#allocation11]   ;;  %s50_s0 = int_to_ptr.vmem [resolvable:$true] %s49_s0 }
   0xd   :  { %55 = dma.hbm_to_vmem [thread:$0]  %s48_s12, 256, %s50_s0, [#allocation9], %s515_s29, %s515_s29, %s516_s30  }
   0xe   :  { %s62_s18 = sshll.u32 %s521_s17, 4  ;;  %s63_s18 = int_to_ptr.vmem [resolvable:$true] %s62_s18 }
   0xf   :  { %68 = dma.hbm_to_vmem [thread:$0]  %s61_s16, 256, %s63_s18, [#allocation12], %s515_s29, %s515_s29, %s516_s30  }
  0x10   :  { %504 = dma.done.wait [#allocation6], 256  }
  0x11   :  { %505 = vsyncadd [#allocation6], 4294967040 }
  0x12   :  { %506 = dma.done.wait [#allocation9], 512  }
  0x13   :  { %507 = vsyncadd [#allocation9], 4294966784 }
  0x14   :  { %508 = dma.done.wait [#allocation12], 256  }
  0x15   :  { %509 = vsyncadd [#allocation12], 4294967040  ;;  %vm90_vm0 = vcmask 523264   ;;  %v522_v0 = vmov 0.0   ;;  %v319_v1 = vld [vmem:[#allocation8 + $0x8] sm:$0xff]  ;;  %v321_v2 = vld [vmem:[#allocation10 + $0x8] sm:$0xff] }
  0x16   :  { %91 = vst.msk [vmem:[#allocation2] sm:$0xff] %vm90_vm0, %v522_v0  ;;  %v323_v3 = vld [vmem:[#allocation11 + $0x8] sm:$0xff]  ;;  %v318_v4 = vld [vmem:[#allocation8] sm:$0xff]  ;;  %128 = vmatpush.bf16.msra.mxu0 %v319_v1  ;;  %165 = vmatpush.bf16.msra.mxu1 %v321_v2  ;;  %v320_v5 = vld [vmem:[#allocation10] sm:$0xff]  ;;  %vm118_vm1 = vcmask 261120   ;;  %vm220_vm2 = vcmask 519168  }
  0x17   :  { %92 = vst.msk [vmem:[#allocation2 + $0x8] sm:$0xff] %vm90_vm0, %v522_v0  ;;  %v97_v6 = vld [vmem:[#allocation5] sm:$0xff]  ;;  %v98_v7 = vld [vmem:[#allocation5 + $0x8] sm:$0xff]  ;;  %201 = vmatpush.bf16.msra.mxu2 %v323_v3  ;;  %v322_v8 = vld [vmem:[#allocation11] sm:$0xff]  ;;  %s523_s2 = smov [#allocation13]   ;;  %s241_s21 = sshll.u32 %s622_s4, 4  ;;  %s242_s21 = int_to_ptr.hbm [resolvable:$true] %s241_s21 }
  0x18   :  { %93 = vst.msk [vmem:[#allocation3] sm:$0xff] %vm90_vm0, %v522_v0  ;;  %v99_v9 = vpack.c.bf16 %v98_v7, %v97_v6  ;;  %s239_s3 = sshll.u32 %s523_s2, 4  ;;  %s524_s22 = smov [#allocation14]   ;;  %s240_s3 = int_to_ptr.vmem [resolvable:$true] %s239_s3 }
  0x19   :  { %94 = vst.msk [vmem:[#allocation3 + $0x8] sm:$0xff] %vm90_vm0, %v522_v0  ;;  %s252_s23 = sshll.u32 %s524_s22, 4  ;;  %s254_s26 = sshll.u32 %s623_s5, 4  ;;  %s253_s23 = int_to_ptr.vmem [resolvable:$true] %s252_s23  ;;  %s255_s26 = int_to_ptr.hbm [resolvable:$true] %s254_s26 }
  0x1a   :  { %95 = vst.msk [vmem:[#allocation4] sm:$0xff] %vm90_vm0, %v522_v0  ;;  %129 = vmatpush.bf16.msra.mxu0 %v318_v4  ;;  %166 = vmatpush.bf16.msra.mxu1 %v320_v5  ;;  %s525_s4 = smov [#allocation16]   ;;  %s267_s7 = sshll.u32 %s624_s6, 4  ;;  %s268_s7 = int_to_ptr.hbm [resolvable:$true] %s267_s7 }
  0x1b   :  { %96 = vst.msk [vmem:[#allocation4 + $0x8] sm:$0xff] %vm90_vm0, %v522_v0  ;;  %202 = vmatpush.bf16.msra.mxu2 %v322_v8  ;;  %s265_s27 = sshll.u32 %s525_s4, 4  ;;  %s266_s27 = int_to_ptr.vmem [resolvable:$true] %s265_s27 }
  0x1d   :  { %299 = vmatmul.msk.bf16.vlgmr.msra.gmra.mxu0 %vm118_vm1, %v99_v9  ;;  %308 = vmatmul.msk.bf16.vlgmr.msra.gmra.mxu1 %vm118_vm1, %v99_v9  ;;  %v100_v10 = vld [vmem:[#allocation2] sm:$0xff] }
  0x1e   :  { %317 = vmatmul.msk.bf16.vlgmr.msra.gmra.mxu2 %vm118_vm1, %v99_v9  ;;  %v101_v17 = vld [vmem:[#allocation2 + $0x8] sm:$0xff] }
  0x1f   :  { %v141_v11 = vld [vmem:[#allocation3] sm:$0xff] }
  0x20   :  { %v142_v18 = vld [vmem:[#allocation3 + $0x8] sm:$0xff] }
  0x21   :  { %v177_v16 = vld [vmem:[#allocation4] sm:$0xff] }
  0x22   :  { %v178_v29 = vld [vmem:[#allocation4 + $0x8] sm:$0xff] }
  0x9a   :  { %v131_v12 = vpop.f32.mrf.mxu0  ;;  %v168_v13 = vpop.f32.mrf.mxu1 }
  0x9b   :  { %v136_v14 = vadd.f32 %v131_v12, %v100_v10  ;;  %v173_v15 = vadd.f32 %v168_v13, %v141_v11 }
  0x9d   :  { %139 = vst.msk [vmem:[#allocation2] sm:$0xff] %vm90_vm0, %v136_v14 }
  0x9e   :  { %175 = vst.msk [vmem:[#allocation3] sm:$0xff] %vm90_vm0, %v173_v15 }
  0xa1   :  { %v204_v19 = vpop.f32.mrf.mxu2 }
  0xa2   :  { %v209_v20 = vadd.f32 %v204_v19, %v177_v16  ;;  %v133_v21 = vpop.f32.mrf.mxu0  ;;  %v170_v22 = vpop.f32.mrf.mxu1 }
  0xa3   :  { %v137_v23 = vadd.f32 %v133_v21, %v101_v17  ;;  %v174_v24 = vadd.f32 %v170_v22, %v142_v18 }
  0xa4   :  { %211 = vst.msk [vmem:[#allocation4] sm:$0xff] %vm90_vm0, %v209_v20  ;;  %v216_v25 = vld [vmem:[#allocation2] sm:$0xff] }
  0xa5   :  { %140 = vst.msk [vmem:[#allocation2 + $0x8] sm:$0xff] %vm90_vm0, %v137_v23  ;;  %v223_v26 = vld [vmem:[#allocation3] sm:$0xff]  ;;  %v218_v27 = vpack.c.bf16 %v216_v25, %v216_v25 }
  0xa6   :  { %176 = vst.msk [vmem:[#allocation3 + $0x8] sm:$0xff] %vm90_vm0, %v174_v24  ;;  %v225_v28 = vpack.c.bf16 %v223_v26, %v223_v26 }
  0xa7   :  { %221 = vst.msk [vmem:[#allocation13] sm:$0xf] %vm220_vm2, %v218_v27 }
  0xa8   :  { %227 = vst.msk [vmem:[#allocation14] sm:$0xf] %vm220_vm2, %v225_v28 }
  0xa9   :  { %v206_v30 = vpop.f32.mrf.mxu2 }
  0xaa   :  { %v210_v31 = vadd.f32 %v206_v30, %v178_v29 }
  0xab   :  { %v229_v32 = vld [vmem:[#allocation4] sm:$0xff] }
  0xac   :  { %212 = vst.msk [vmem:[#allocation4 + $0x8] sm:$0xff] %vm90_vm0, %v210_v31  ;;  %v217_v33 = vld [vmem:[#allocation2 + $0x8] sm:$0xff]  ;;  %v231_v34 = vpack.c.bf16 %v229_v32, %v229_v32 }
  0xad   :  { %v224_v35 = vld [vmem:[#allocation3 + $0x8] sm:$0xff]  ;;  %v219_v36 = vpack.c.bf16 %v217_v33, %v217_v33 }
  0xae   :  { %v226_v37 = vpack.c.bf16 %v224_v35, %v224_v35  ;;  %233 = vst.msk [vmem:[#allocation16] sm:$0xf] %vm220_vm2, %v231_v34 }
  0xaf   :  { %222 = vst.msk [vmem:[#allocation13 + $0x4] sm:$0xf] %vm220_vm2, %v219_v36 }
  0xb0   :  { %228 = vst.msk [vmem:[#allocation14 + $0x4] sm:$0xf] %vm220_vm2, %v226_v37  ;;  %247 = dma.vmem_to_hbm [thread:$0]  %s240_s3, 128, %s242_s21, [#allocation7], %s515_s29, %s515_s29, %s516_s30  }
  0xb1   :  { %260 = dma.vmem_to_hbm [thread:$0]  %s253_s23, 128, %s255_s26, [#allocation15], %s515_s29, %s515_s29, %s516_s30  }
  0xb3   :  { %v230_v38 = vld [vmem:[#allocation4 + $0x8] sm:$0xff] }
  0xb4   :  { %v232_v39 = vpack.c.bf16 %v230_v38, %v230_v38 }
  0xb6   :  { %234 = vst.msk [vmem:[#allocation16 + $0x4] sm:$0xf] %vm220_vm2, %v232_v39 }
  0xb7   :  { %273 = dma.vmem_to_hbm [thread:$0]  %s266_s27, 128, %s268_s7, [#allocation15], %s515_s29, %s515_s29, %s516_s30  }
  0xb8   :  { %510 = dma.done.wait [#allocation7], 128  }
  0xb9   :  { %511 = vsyncadd [#allocation7], 4294967168 }
  0xba   :  { %512 = dma.done.wait [#allocation15], 256  }
  0xbb   :  { %513 = vsyncadd [#allocation15], 4294967040 }
  0xbc   :  { %286 = vsyncpa [#allocation6], 1 }
  0xbd   :  { %287 = vsyncpa [#allocation9], 1 }
  0xbe   :  { %288 = vsyncpa [#allocation12], 1 }
  0xbf   :  { %289 = vsyncpa [#allocation7], 1 }
  0xc0   :  { %290 = vsyncpa [#allocation15], 1 }

</bundles_post_ra>
